<compile_context>
chip_gen: v7x
topology: tpu7x:2x2x1
jax: 0.10.0
libtpu: 0.0.40
codegen_flags: <defaults>
</compile_context>

<pallas_src>
import functools

import jax
import jax.numpy as jnp
from jax.experimental import pallas as pl
from jax.experimental.pallas import tpu as pltpu


def _round_up(n, m):
    return ((n + m - 1) // m) * m


def mlp_kernel(x_ref, w1_ref, b1_ref, w2_ref, b2_ref, w3_ref, b3_ref, o_ref):
    # In-kernel cast of x to the matmul dtype (x arrives f32; cast is free-ish on VPU).
    x = x_ref[...].astype(w1_ref.dtype)
    # fc1 + ReLU (MXU dot, f32 accumulation; bias/ReLU in f32)
    h1 = jnp.dot(x, w1_ref[...], preferred_element_type=jnp.float32)
    h1 = jnp.maximum(h1 + b1_ref[...], 0.0)
    # fc2 + ReLU
    h2 = jnp.dot(h1.astype(w2_ref.dtype), w2_ref[...],
                 preferred_element_type=jnp.float32)
    h2 = jnp.maximum(h2 + b2_ref[...], 0.0)
    # fc3 (no activation), compact (tb, action_dim) store
    out = jnp.dot(h2.astype(w3_ref.dtype), w3_ref[...],
                  preferred_element_type=jnp.float32)
    o_ref[...] = (out + b3_ref[...]).astype(o_ref.dtype)


@functools.partial(jax.jit, static_argnames=("compute_dtype", "block_b"))
def rq_network_forward(x, params, *, compute_dtype=jnp.bfloat16, block_b=2048):
    """Fused 3-layer MLP forward.  x: (B, state_dim) f32.  Returns (B, action_dim) f32."""
    w1, b1, w2, b2, w3, b3 = params
    B, state_dim = x.shape
    hidden = w1.shape[1]
    action_dim = w3.shape[1]

    # Batch tile: large (amortizes ~0.35us/grid-step), 16-sublane aligned for bf16
    # packing.  If a single tile covers the whole batch, use the exact batch size
    # (block dim == full array dim is always legal) so no padded rows exist at all.
    tb = max(16, _round_up(block_b, 16))
    if tb >= B:
        tb = B
    grid = (pl.cdiv(B, tb),)

    # Weights cast once in the wrapper (tiny, ~100 KiB total); biases stay f32.
    w1c = w1.astype(compute_dtype)
    w2c = w2.astype(compute_dtype)
    w3c = w3.astype(compute_dtype)

    out = pl.pallas_call(
        mlp_kernel,
        out_shape=jax.ShapeDtypeStruct((B, action_dim), jnp.float32),
        grid=grid,
        in_specs=[
            pl.BlockSpec((tb, state_dim), lambda i: (i, 0)),      # x tile (pipelined)
            pl.BlockSpec((state_dim, hidden), lambda i: (0, 0)),  # w1 (VMEM-resident)
            pl.BlockSpec((1, hidden), lambda i: (0, 0)),          # b1
            pl.BlockSpec((hidden, hidden), lambda i: (0, 0)),     # w2
            pl.BlockSpec((1, hidden), lambda i: (0, 0)),          # b2
            pl.BlockSpec((hidden, action_dim), lambda i: (0, 0)), # w3 (compact)
            pl.BlockSpec((1, action_dim), lambda i: (0, 0)),      # b3 (compact)
        ],
        out_specs=pl.BlockSpec((tb, action_dim), lambda i: (i, 0)),
        compiler_params=pltpu.CompilerParams(
            dimension_semantics=("parallel",),  # shard batch tiles across TCs (v7x)
        ),
    )(x, w1c, b1, w2c, b2, w3c, b3)

    return out


def init_params(key, state_dim, action_dim, hidden=128):
    """Deterministic init mirroring nn.Linear (weights stored as (in, out))."""
    ks = jax.random.split(key, 6)

    def linear_init(kw, kb, fan_in, fan_out):
        bound = 1.0 / jnp.sqrt(jnp.float32(fan_in))
        w = jax.random.uniform(kw, (fan_in, fan_out), jnp.float32, -bound, bound)
        b = jax.random.uniform(kb, (1, fan_out), jnp.float32, -bound, bound)
        return w, b

    w1, b1 = linear_init(ks[0], ks[1], state_dim, hidden)
    w2, b2 = linear_init(ks[2], ks[3], hidden, hidden)
    w3, b3 = linear_init(ks[4], ks[5], hidden, action_dim)
    return (w1, b1, w2, b2, w3, b3)


def reference_forward(x, params, compute_dtype=jnp.float32):
    """Pure-JAX reference with the same dtype policy as the kernel."""
    w1, b1, w2, b2, w3, b3 = params
    xc = x.astype(compute_dtype)
    h1 = jnp.dot(xc, w1.astype(compute_dtype),
                 preferred_element_type=jnp.float32) + b1
    h1 = jnp.maximum(h1, 0.0)
    h2 = jnp.dot(h1.astype(compute_dtype), w2.astype(compute_dtype),
                 preferred_element_type=jnp.float32) + b2
    h2 = jnp.maximum(h2, 0.0)
    return jnp.dot(h2.astype(compute_dtype), w3.astype(compute_dtype),
                   preferred_element_type=jnp.float32) + b3


if __name__ == "__main__":
    state_dim = 8
    action_dim = 4
    batch = 2

    key = jax.random.PRNGKey(0)
    k_params, k_x, k_x2 = jax.random.split(key, 3)
    params = init_params(k_params, state_dim, action_dim)

    # --- small deployed-style batch (B=2): single full-array block, no padding ---
    x = jax.random.normal(k_x, (batch, state_dim), jnp.float32)

    # f32 path: tight check against reference.
    out_f32 = jax.block_until_ready(
        rq_network_forward(x, params, compute_dtype=jnp.float32))
    ref_f32 = reference_forward(x, params, jnp.float32)
    assert out_f32.shape == (batch, action_dim)
    assert jnp.allclose(out_f32, ref_f32, atol=2e-3, rtol=2e-3), "f32 mismatch vs reference"

    # bf16 path (default, MXU-native): looser tolerance.
    out_bf16 = jax.block_until_ready(rq_network_forward(x, params))
    ref_bf16 = reference_forward(x, params, jnp.bfloat16)
    assert jnp.allclose(out_bf16, ref_bf16, atol=2e-2, rtol=2e-2), "bf16 mismatch vs reference"

    # --- larger, non-tile-divisible batch: exercises the batch grid + the
    #     Pallas partial last block (300 rows, tb=128 -> 3 steps, last one masked) ---
    big_batch = 300
    xb = jax.random.normal(k_x2, (big_batch, state_dim), jnp.float32)
    out_big = jax.block_until_ready(
        rq_network_forward(xb, params, compute_dtype=jnp.float32, block_b=128))
    ref_big = reference_forward(xb, params, jnp.float32)
    assert out_big.shape == (big_batch, action_dim)
    assert jnp.allclose(out_big, ref_big, atol=2e-3, rtol=2e-3), "tiled mismatch vs reference"

    print("KERNEL_OK")
</pallas_src>

<mosaic_0001>
module attributes {stable_mosaic.version = 11 : i64} {
  func.func @mlp_kernel(%arg0: i32, %arg1: memref<2x8xf32, #tpu.memory_space<vmem>>, %arg2: memref<8x128xf32, #tpu.memory_space<vmem>>, %arg3: memref<1x128xf32, #tpu.memory_space<vmem>>, %arg4: memref<128x128xf32, #tpu.memory_space<vmem>>, %arg5: memref<1x128xf32, #tpu.memory_space<vmem>>, %arg6: memref<128x4xf32, #tpu.memory_space<vmem>>, %arg7: memref<1x4xf32, #tpu.memory_space<vmem>>, %arg8: memref<2x4xf32, #tpu.memory_space<vmem>>) attributes {dimension_semantics = [#tpu.dimension_semantics<parallel>], iteration_bounds = array<i64: 1>, scalar_prefetch = 0 : i64, scratch_operands = 0 : i64, tpu.core_type = #tpu.core_type<tc>, window_params = [{transform_indices = @transform_0, window_bounds = array<i64: 2, 8>}, {pipeline_mode = #tpu.pipeline_mode<synchronous>, transform_indices = @transform_1, window_bounds = array<i64: 8, 128>}, {pipeline_mode = #tpu.pipeline_mode<synchronous>, transform_indices = @transform_2, window_bounds = array<i64: 1, 128>}, {pipeline_mode = #tpu.pipeline_mode<synchronous>, transform_indices = @transform_3, window_bounds = array<i64: 128, 128>}, {pipeline_mode = #tpu.pipeline_mode<synchronous>, transform_indices = @transform_4, window_bounds = array<i64: 1, 128>}, {pipeline_mode = #tpu.pipeline_mode<synchronous>, transform_indices = @transform_5, window_bounds = array<i64: 128, 4>}, {pipeline_mode = #tpu.pipeline_mode<synchronous>, transform_indices = @transform_6, window_bounds = array<i64: 1, 4>}, {transform_indices = @transform_7, window_bounds = array<i64: 2, 4>}]} {
    %c0 = arith.constant 0 : index
    %c0_0 = arith.constant 0 : index
    %0 = vector.load %arg1[%c0, %c0_0] : memref<2x8xf32, #tpu.memory_space<vmem>>, vector<2x8xf32>
    %c0_1 = arith.constant 0 : index
    %c0_2 = arith.constant 0 : index
    %1 = vector.load %arg2[%c0_1, %c0_2] : memref<8x128xf32, #tpu.memory_space<vmem>>, vector<8x128xf32>
    %cst = arith.constant dense<0.000000e+00> : vector<2x128xf32>
    %2 = tpu.matmul %0, %1, %cst {dimension_numbers = #tpu.dot_dimension_numbers<[1], [0], [0], [1], [0, 0, 1, 1], [], []>} : vector<2x8xf32>, vector<8x128xf32>, vector<2x128xf32> -> vector<2x128xf32>
    %c0_3 = arith.constant 0 : index
    %c0_4 = arith.constant 0 : index
    %3 = vector.load %arg3[%c0_3, %c0_4] : memref<1x128xf32, #tpu.memory_space<vmem>>, vector<1x128xf32>
    %4 = vector.broadcast %3 : vector<1x128xf32> to vector<2x128xf32>
    %5 = arith.addf %2, %4 : vector<2x128xf32>
    %cst_5 = arith.constant 0.000000e+00 : f32
    %6 = vector.broadcast %cst_5 : f32 to vector<2x128xf32>
    %7 = arith.maximumf %5, %6 : vector<2x128xf32>
    %c0_6 = arith.constant 0 : index
    %c0_7 = arith.constant 0 : index
    %8 = vector.load %arg4[%c0_6, %c0_7] : memref<128x128xf32, #tpu.memory_space<vmem>>, vector<128x128xf32>
    %cst_8 = arith.constant dense<0.000000e+00> : vector<2x128xf32>
    %9 = tpu.matmul %7, %8, %cst_8 {dimension_numbers = #tpu.dot_dimension_numbers<[1], [0], [0], [1], [0, 0, 1, 1], [], []>} : vector<2x128xf32>, vector<128x128xf32>, vector<2x128xf32> -> vector<2x128xf32>
    %c0_9 = arith.constant 0 : index
    %c0_10 = arith.constant 0 : index
    %10 = vector.load %arg5[%c0_9, %c0_10] : memref<1x128xf32, #tpu.memory_space<vmem>>, vector<1x128xf32>
    %11 = vector.broadcast %10 : vector<1x128xf32> to vector<2x128xf32>
    %12 = arith.addf %9, %11 : vector<2x128xf32>
    %cst_11 = arith.constant 0.000000e+00 : f32
    %13 = vector.broadcast %cst_11 : f32 to vector<2x128xf32>
    %14 = arith.maximumf %12, %13 : vector<2x128xf32>
    %c0_12 = arith.constant 0 : index
    %c0_13 = arith.constant 0 : index
    %15 = vector.load %arg6[%c0_12, %c0_13] : memref<128x4xf32, #tpu.memory_space<vmem>>, vector<128x4xf32>
    %cst_14 = arith.constant dense<0.000000e+00> : vector<2x4xf32>
    %16 = tpu.matmul %14, %15, %cst_14 {dimension_numbers = #tpu.dot_dimension_numbers<[1], [0], [0], [1], [0, 0, 1, 1], [], []>} : vector<2x128xf32>, vector<128x4xf32>, vector<2x4xf32> -> vector<2x4xf32>
    %c0_15 = arith.constant 0 : index
    %c0_16 = arith.constant 0 : index
    %17 = vector.load %arg7[%c0_15, %c0_16] : memref<1x4xf32, #tpu.memory_space<vmem>>, vector<1x4xf32>
    %18 = vector.broadcast %17 : vector<1x4xf32> to vector<2x4xf32>
    %19 = arith.addf %16, %18 : vector<2x4xf32>
    %c0_17 = arith.constant 0 : index
    %c0_18 = arith.constant 0 : index
    %20 = vector.load %arg8[%c0_17, %c0_18] : memref<2x4xf32, #tpu.memory_space<vmem>>, vector<2x4xf32>
    tpu.vector_store %arg8[%c0_17, %c0_18], %19 {strides = array<i32>} : memref<2x4xf32, #tpu.memory_space<vmem>>, vector<2x4xf32>,
    return
  }
  func.func @transform_0(%arg0: i32) -> (i32, i32) {
    %c0_i32 = arith.constant 0 : i32
    %c0_i32_0 = arith.constant 0 : i32
    return %arg0, %c0_i32 : i32, i32
  }
  func.func @transform_1(%arg0: i32) -> (i32, i32) {
    %c0_i32 = arith.constant 0 : i32
    %c0_i32_0 = arith.constant 0 : i32
    %c0_i32_1 = arith.constant 0 : i32
    return %c0_i32, %c0_i32_0 : i32, i32
  }
  func.func @transform_2(%arg0: i32) -> (i32, i32) {
    %c0_i32 = arith.constant 0 : i32
    %c0_i32_0 = arith.constant 0 : i32
    %c0_i32_1 = arith.constant 0 : i32
    return %c0_i32, %c0_i32_0 : i32, i32
  }
  func.func @transform_3(%arg0: i32) -> (i32, i32) {
    %c0_i32 = arith.constant 0 : i32
    %c0_i32_0 = arith.constant 0 : i32
    %c0_i32_1 = arith.constant 0 : i32
    return %c0_i32, %c0_i32_0 : i32, i32
  }
  func.func @transform_4(%arg0: i32) -> (i32, i32) {
    %c0_i32 = arith.constant 0 : i32
    %c0_i32_0 = arith.constant 0 : i32
    %c0_i32_1 = arith.constant 0 : i32
    return %c0_i32, %c0_i32_0 : i32, i32
  }
  func.func @transform_5(%arg0: i32) -> (i32, i32) {
    %c0_i32 = arith.constant 0 : i32
    %c0_i32_0 = arith.constant 0 : i32
    %c0_i32_1 = arith.constant 0 : i32
    return %c0_i32, %c0_i32_0 : i32, i32
  }
  func.func @transform_6(%arg0: i32) -> (i32, i32) {
    %c0_i32 = arith.constant 0 : i32
    %c0_i32_0 = arith.constant 0 : i32
    %c0_i32_1 = arith.constant 0 : i32
    return %c0_i32, %c0_i32_0 : i32, i32
  }
  func.func @transform_7(%arg0: i32) -> (i32, i32) {
    %c0_i32 = arith.constant 0 : i32
    %c0_i32_0 = arith.constant 0 : i32
    return %arg0, %c0_i32 : i32, i32
  }
}

</mosaic_0001>

<bundles_post_ra>
// kernel: rq_network_forward.1
= control target key start
LH: loop header
LB: loop body
LE: loop exit
PB: predicated region body
PF: predicated region fallthrough
CT: control target
= control target key end

     0   :  { %vm36_vm0 = vcmask 64512   ;;  %v505_v2 = vmov 0.0   ;;  %vm506_vm1 = vmmov 0   ;;  %v507_v6 = vmov 0.0|0.0   ;;  %s691_s0 = inlined_call_operand.vmem [shape: f32[2,8], index: 0, kind: input, shape index: {}]   ;;  %s692_s1 = inlined_call_operand.vmem [shape: f32[8,128], index: 1, kind: input, shape index: {}]   ;;  %s693_s2 = inlined_call_operand.vmem [shape: f32[1,128], index: 2, kind: input, shape index: {}]   ;;  %s694_s3 = inlined_call_operand.vmem [shape: f32[128,128], index: 3, kind: input, shape index: {}]   ;;  %s695_s4 = inlined_call_operand.vmem [shape: f32[1,128], index: 4, kind: input, shape index: {}]   ;;  %s696_s5 = inlined_call_operand.vmem [shape: f32[128,4], index: 5, kind: input, shape index: {}]   ;;  %s697_s6 = inlined_call_operand.vmem [shape: f32[1,4], index: 6, kind: input, shape index: {}]   ;;  %s698_s7 = inlined_call_operand.hbm [shape: f32[2,4], index: 7, kind: output, shape index: {}]  }
   0x1   :  { %v28_v0 = vld [vmem:[%s692_s1] sm:$0xff]  ;;  %354 = vmatprep.subr.mxu0 %v505_v2  ;;  %356 = vmatprep.mubr.msk.f32.mxu0 %vm506_vm1, %v505_v2  ;;  %v112_v4 = vld [vmem:[%s694_s3 + $0x8] sm:$0xff]  ;;  %v113_v5 = vld [vmem:[%s694_s3 + $0x10] sm:$0xff] }
   0x2   :  { %v27_v1 = vld [vmem:[%s691_s0] sm:$0x3]  ;;  %355 = vmatpush3.msra.mxu0 %v28_v0  ;;  %429 = vmatprep.subr.bf16.mxu1 %v507_v6  ;;  %v114_v8 = vld [vmem:[%s694_s3 + $0x18] sm:$0xff]  ;;  %v116_v11 = vld [vmem:[%s694_s3 + $0x28] sm:$0xff] }
   0x3   :  { %v111_v3 = vld [vmem:[%s694_s3] sm:$0xff]  ;;  %357 = vmatmul.mubr.msk.f32.vlgmr.msra.gmra.mrb[0].mxu0 %vm36_vm0, %v27_v1  ;;  %391 = vmatprep.mubr.msk.f32.mxu1 %vm506_vm1, %v505_v2  ;;  %v433_v9 = vpack.c.bf16 %v114_v8, %v113_v5 }
   0x4   :  { %v430_v7 = vpack.c.bf16 %v112_v4, %v111_v3  ;;  %453 = vmatprep.subr.bf16.mxu0 %v507_v6  ;;  %v115_v10 = vld [vmem:[%s694_s3 + $0x20] sm:$0xff]  ;;  %426 = vmatprep.mubr.msk.f32.mxu0 %vm506_vm1, %v505_v2 }
   0x6   :  { %431 = vmatpush3.bf16.msra.mxu1 %v430_v7 }
   0x7   :  { %432 = vmatprep.subr.bf16.mxu1 %v507_v6 }
   0x8   :  { %12 = vsyncpa [#allocation3], 0  ;;  %v436_v12 = vpack.c.bf16 %v116_v11, %v115_v10  ;;  %v117_v13 = vld [vmem:[%s694_s3 + $0x30] sm:$0xff]  ;;  %v118_v14 = vld [vmem:[%s694_s3 + $0x38] sm:$0xff]  ;;  %s508_s20 = smov [#allocation2]   ;;  %vm298_vm2 = vcmask 25600  }
   0x9   :  { %v439_v15 = vpack.c.bf16 %v118_v14, %v117_v13  ;;  %v119_v16 = vld [vmem:[%s694_s3 + $0x40] sm:$0xff]  ;;  %v120_v17 = vld [vmem:[%s694_s3 + $0x48] sm:$0xff]  ;;  %v121_v19 = vld [vmem:[%s694_s3 + $0x50] sm:$0xff]  ;;  %s306_s21 = sshll.u32 %s508_s20, 4  ;;  %s307_s21 = int_to_ptr.vmem [resolvable:$true] %s306_s21 }
   0xa   :  { %434 = vmatpush3.bf16.msra.mxu1 %v433_v9  ;;  %v442_v18 = vpack.c.bf16 %v120_v17, %v119_v16  ;;  %v122_v20 = vld [vmem:[%s694_s3 + $0x58] sm:$0xff]  ;;  %v123_v22 = vld [vmem:[%s694_s3 + $0x60] sm:$0xff]  ;;  %v124_v23 = vld [vmem:[%s694_s3 + $0x68] sm:$0xff]  ;;  %p486_p1 = scmp.lt.s32.totalorder %s307_s21, %s307_s21 }
   0xb   :  { %435 = vmatprep.subr.bf16.mxu1 %v507_v6  ;;  %v445_v21 = vpack.c.bf16 %v122_v20, %v121_v19  ;;  %v448_v24 = vpack.c.bf16 %v124_v23, %v123_v22  ;;  %v125_v25 = vld [vmem:[%s694_s3 + $0x70] sm:$0xff]  ;;  %v126_v26 = vld [vmem:[%s694_s3 + $0x78] sm:$0xff]  ;;  %v205_v28 = vld [vmem:[%s696_s5] sm:$0xff] }
   0xc   :  { %v451_v27 = vpack.c.bf16 %v126_v26, %v125_v25  ;;  %v206_v29 = vld [vmem:[%s696_s5 + $0x8] sm:$0xff]  ;;  %v207_v30 = vld [vmem:[%s696_s5 + $0x10] sm:$0xff]  ;;  %v208_v32 = vld [vmem:[%s696_s5 + $0x18] sm:$0xff] }
   0xd   :  { %v454_v31 = vpack.c.bf16 %v206_v29, %v205_v28  ;;  %v457_v33 = vpack.c.bf16 %v208_v32, %v207_v30  ;;  %v209_v34 = vld [vmem:[%s696_s5 + $0x20] sm:$0xff]  ;;  %v210_v35 = vld [vmem:[%s696_s5 + $0x28] sm:$0xff]  ;;  %v211_v37 = vld [vmem:[%s696_s5 + $0x30] sm:$0xff] }
   0xe   :  { %437 = vmatpush3.bf16.msra.mxu1 %v436_v12  ;;  %v460_v36 = vpack.c.bf16 %v210_v35, %v209_v34  ;;  %v212_v38 = vld [vmem:[%s696_s5 + $0x38] sm:$0xff]  ;;  %v213_v40 = vld [vmem:[%s696_s5 + $0x40] sm:$0xff]  ;;  %v214_v41 = vld [vmem:[%s696_s5 + $0x48] sm:$0xff] }
   0xf   :  { %438 = vmatprep.subr.bf16.mxu1 %v507_v6  ;;  %455 = vmatpush3.bf16.msra.mxu0 %v454_v31  ;;  %v463_v39 = vpack.c.bf16 %v212_v38, %v211_v37  ;;  %v466_v42 = vpack.c.bf16 %v214_v41, %v213_v40  ;;  %v215_v43 = vld [vmem:[%s696_s5 + $0x50] sm:$0xff]  ;;  %v216_v44 = vld [vmem:[%s696_s5 + $0x58] sm:$0xff]  ;;  %v217_v46 = vld [vmem:[%s696_s5 + $0x60] sm:$0xff] }
  0x10   :  { %456 = vmatprep.subr.bf16.mxu0 %v507_v6  ;;  %v469_v45 = vpack.c.bf16 %v216_v44, %v215_v43  ;;  %v218_v47 = vld [vmem:[%s696_s5 + $0x68] sm:$0xff]  ;;  %v314_v49 = vld [vmem:[%s693_s2] ss:$0 sm:$0xff]  ;;  %v219_v54 = vld [vmem:[%s696_s5 + $0x70] sm:$0xff] }
  0x11   :  { %v472_v48 = vpack.c.bf16 %v218_v47, %v217_v46  ;;  %v220_v55 = vld [vmem:[%s696_s5 + $0x78] sm:$0xff]  ;;  %v316_v57 = vld [vmem:[%s695_s4] ss:$0 sm:$0xff]  ;;  %s481_s5 = scalar_lea.vmem %s307_s21, 32 }
  0x12   :  { %440 = vmatpush3.bf16.msra.mxu1 %v439_v15  ;;  %v475_v56 = vpack.c.bf16 %v220_v55, %v219_v54  ;;  %v317_v62 = vld [vmem:[%s697_s6] ss:$0 sm:$0xff]  ;;  %p482_p0 = scmp.ne.s32.totalorder %s307_s21, %s481_s5  ;;  %p487_p2 = scmp.lt.s32.totalorder %s481_s5, %s481_s5 }
  0x13   :  { %441 = vmatprep.subr.bf16.mxu1 %v507_v6  ;;  %458 = vmatpush3.bf16.msra.mxu0 %v457_v33 }
  0x14   :  { %459 = vmatprep.subr.bf16.mxu0 %v507_v6  ;;  %p488_p3 = por %p487_p2, %p486_p1 }
  0x16   :  { %443 = vmatpush3.bf16.msra.mxu1 %v442_v18  ;;  %p489_p4 = pnand %p488_p3, %p482_p0 }
  0x17   :  { %444 = vmatprep.subr.bf16.mxu1 %v507_v6  ;;  %461 = vmatpush3.bf16.msra.mxu0 %v460_v36 }
  0x18   :  { %462 = vmatprep.subr.bf16.mxu0 %v507_v6 }
  0x1a   :  { %446 = vmatpush3.bf16.msra.mxu1 %v445_v21 }
  0x1b   :  { %447 = vmatprep.subr.bf16.mxu1 %v507_v6  ;;  %464 = vmatpush3.bf16.msra.mxu0 %v463_v39 }
  0x1c   :  { %465 = vmatprep.subr.bf16.mxu0 %v507_v6 }
  0x1e   :  { %449 = vmatpush3.bf16.msra.mxu1 %v448_v24 }
  0x1f   :  { %450 = vmatprep.subr.bf16.mxu1 %v507_v6  ;;  %467 = vmatpush3.bf16.msra.mxu0 %v466_v42 }
  0x20   :  { %468 = vmatprep.subr.bf16.mxu0 %v507_v6 }
  0x22   :  { %452 = vmatpush3.bf16.msra.mxu1 %v451_v27 }
  0x23   :  { %470 = vmatpush3.bf16.msra.mxu0 %v469_v45 }
  0x24   :  { %471 = vmatprep.subr.bf16.mxu0 %v507_v6 }
  0x27   :  { %473 = vmatpush3.bf16.msra.mxu0 %v472_v48 }
  0x28   :  { %474 = vmatprep.subr.bf16.mxu0 %v507_v6 }
  0x2b   :  { %476 = vmatpush3.bf16.msra.mxu0 %v475_v56 }
  0xd6   :  { %v106_v50 = vpop.f32.mrb[0].mxu0 }
  0xd7   :  { %v107_v51 = vadd.f32 %v314_v49, %v106_v50  ;;  %v358_v52 = vpop.f32.mrb[1].mxu0 }
  0xd9   :  { %v110_v53 = vmax.f32 %v107_v51, 0.0 }
  0xdb   :  { %392 = vmatmul.mubr.f32.vlgmr.msra.gmra.mrb[0].mxu1 %v110_v53 }
 0x1ae   :  { %v200_v58 = vpop.f32.mrb[0].mxu1 }
 0x1af   :  { %v201_v59 = vadd.f32 %v316_v57, %v200_v58  ;;  %v393_v60 = vpop.f32.mrb[1].mxu1 }
 0x1b1   :  { %v204_v61 = vmax.f32 %v201_v59, 0.0 }
 0x1b3   :  { %427 = vmatmul.mubr.f32.vlgmr.msra.gmra.mrb[2].mxu0 %v204_v61 }
 0x286   :  { %v294_v63 = vpop.f32.mrb[2].mxu0 }
 0x287   :  { %v295_v0 = vadd.f32 %v317_v62, %v294_v63  ;;  %v428_v1 = vpop.f32.mrb[3].mxu0 }
 0x289   :  { %299 = vst.msk [vmem:[#allocation2] sm:$0x3] %vm298_vm2, %v295_v0 }
 0x28a   :  { %492 = shalt.err (!%p489_p4)
}
 0x28b   :  { %s493_s23 = scalar_lea.hbm %s698_s7, 32 }
 0x28c   :  { %p494_p5 = scmp.ne.s32.totalorder %s698_s7, %s493_s23  ;;  %p497_p6 = scmp.lt.u32.totalorder %s493_s23, %s698_s7 }
 0x28e   :  { %p499_p7 = pnand %p497_p6, %p494_p5 }
 0x290   :  { %502 = shalt.err (!%p499_p7)
}
 0x291   :  { %309 = dma.vmem_to_hbm [thread:$0]  %s307_s21, 32, %s698_s7, [#allocation3]  }
 0x292   :  { %503 = dma.done.wait [#allocation3], 32  }
 0x293   :  { %504 = vsyncadd [#allocation3], 4294967264 }
 0x294   :  { %313 = vsyncpa [#allocation3], 1 }

</bundles_post_ra>
